<compile_context>
chip_gen: v6e
topology: v6e:2x2x1
jax: 0.10.0
libtpu: 0.0.40
codegen_flags: <defaults>
</compile_context>

<pallas_src>
import functools

import jax
import jax.numpy as jnp
from jax.experimental import pallas as pl
from jax.experimental.pallas import tpu as pltpu

# ---- synthetic hyper-parameters (small, consistent with the module) -------------
N_CLS   = 4                    # len(classnames)
N_CTX   = 4                    # args.coop_n_ctx
CTX_DIM = 128                  # clip_model.ln_final.weight.shape[0]
GNN_OUT = 128                  # args.gnn_output
HID     = GNN_OUT // 16        # meta_net hidden width = 8
CTX_LEN = 16                   # args.context_length
SUF_LEN = CTX_LEN - 1 - N_CTX  # token_suffix length
BATCH   = 2


def _prompt_kernel(x_ref, w1_ref, b1_ref, w2_ref, b2_ref, template_ref, out_ref,
                   *, n_ctx):
    """One grid step = one batch tile of TB image-feature rows."""
    x = x_ref[...]                                                    # (TB, GNN_OUT)
    n_cls, ctx_len, d = template_ref.shape

    # meta_net: Linear1 -> ReLU -> Linear2 (tiny; fully hidden under the
    # output writeback DMA -> left in-kernel, f32 accumulation).
    h = jnp.dot(x, w1_ref[...], preferred_element_type=jnp.float32) + b1_ref[...]
    h = jnp.maximum(h, 0.0)
    bias = jnp.dot(h, w2_ref[...], preferred_element_type=jnp.float32) + b2_ref[...]  # (TB, D)

    # ctx-row mask built in-registers (no operand DMA): 1.0 on rows [1, 1+n_ctx).
    t = jax.lax.broadcasted_iota(jnp.int32, (ctx_len, 1), 0)
    mask = jnp.logical_and(t >= 1, t < 1 + n_ctx).astype(jnp.float32)  # (CTX_LEN, 1)

    # Assemble the full prompt tile in vregs:
    #   out[b, c, t, :] = template[c, t, :] + mask[t] * bias[b, :]
    tmpl = template_ref[...]                                          # (N_CLS, CTX_LEN, D)
    assembled = (tmpl[None, :, :, :]
                 + mask[None, None, :, :] * bias[:, None, None, :])   # (TB, N_CLS, CTX_LEN, D)

    # Single unmasked, lane-dense store; cast to the output dtype (bf16) here only.
    out_ref[...] = assembled.astype(out_ref.dtype)


def prompt_learner_forward(im_features, w1, b1, w2, b2, ctx, prefix, suffix,
                           *, out_dtype=jnp.bfloat16):
    B, gnn_out = im_features.shape
    n_ctx, ctx_dim = ctx.shape
    n_cls = prefix.shape[0]
    suf_len = suffix.shape[1]
    ctx_len = 1 + n_ctx + suf_len
    hid = w1.shape[1]

    im_features = im_features.astype(jnp.float32)

    # ---- batch-independent prompt template (built once, plain XLA) ----------------
    #   template[c] = [prefix[c]; ctx; suffix[c]]  -> kernel only adds the per-image bias.
    template = jnp.concatenate(
        [prefix, jnp.broadcast_to(ctx[None], (n_cls, n_ctx, ctx_dim)), suffix], axis=1
    ).astype(jnp.float32)                                             # (N_CLS, CTX_LEN, D)

    # ---- generation-aware batch tiling ---------------------------------------------
    out_itemsize = jnp.dtype(out_dtype).itemsize
    row_out_bytes = n_cls * ctx_len * ctx_dim * out_itemsize          # output bytes / batch row
    row_in_bytes = gnn_out * 4                                        # input bytes / batch row
    param_bytes = 4 * (w1.size + b1.size + w2.size + b2.size + template.size)

    try:
        vmem_cap = int(pltpu.get_tpu_info().vmem_capacity_bytes)      # 128 MiB v5e/v6e, 64 MiB v7x
    except Exception:
        vmem_cap = 64 << 20                                           # conservative fallback
    vmem_budget = vmem_cap // 3                                       # keep well under physical
    tb_cap = (vmem_budget - param_bytes) // (2 * (row_out_bytes + row_in_bytes))
    tb_cap = int(max(8, min(tb_cap, 256)))

    # Never split small batches (no TB=1 / M=1 degenerate steps); for large batches
    # prefer a multiple-of-8 divisor of B so no padded garbage tile is written back.
    if B <= tb_cap:
        tb = B
    else:
        tb = 0
        for d in range((min(tb_cap, B) // 8) * 8, 0, -8):
            if B % d == 0:
                tb = d
                break
        if tb == 0:
            tb = max(8, (min(tb_cap, B) // 8) * 8)

    b_pad = pl.cdiv(B, tb) * tb
    if b_pad != B:
        # TODO(synk): shrink the last grid step's block instead of padding for ragged B.
        im_features = jnp.pad(im_features, ((0, b_pad - B), (0, 0)))
    num_steps = b_pad // tb

    # VMEM budget actually needed (double-buffered in/out blocks + resident params).
    need_bytes = 2 * tb * (row_out_bytes + row_in_bytes) + param_bytes
    vmem_limit = int(max(32 << 20, need_bytes + (4 << 20)))

    # ---- cost estimate (lets XLA schedule this tiny kernel sensibly) --------------
    flops = (2 * b_pad * (gnn_out * hid + hid * ctx_dim)
             + 2 * b_pad * n_cls * ctx_len * ctx_dim)
    bytes_accessed = 4 * b_pad * gnn_out + param_bytes + b_pad * row_out_bytes

    kernel = functools.partial(_prompt_kernel, n_ctx=n_ctx)

    out = pl.pallas_call(
        kernel,
        out_shape=jax.ShapeDtypeStruct((b_pad, n_cls, ctx_len, ctx_dim), out_dtype),
        grid=(num_steps,),
        in_specs=[
            pl.BlockSpec((tb, gnn_out),             lambda i: (i, 0)),       # im_features tile
            pl.BlockSpec((gnn_out, hid),            lambda i: (0, 0)),       # W1
            pl.BlockSpec((1, hid),                  lambda i: (0, 0)),       # b1
            pl.BlockSpec((hid, ctx_dim),            lambda i: (0, 0)),       # W2
            pl.BlockSpec((1, ctx_dim),              lambda i: (0, 0)),       # b2
            pl.BlockSpec((n_cls, ctx_len, ctx_dim), lambda i: (0, 0, 0)),    # prompt template
        ],
        out_specs=pl.BlockSpec((tb, n_cls, ctx_len, ctx_dim), lambda i: (i, 0, 0, 0)),
        compiler_params=pltpu.CompilerParams(
            dimension_semantics=(("parallel",) if num_steps >= 2 else ("arbitrary",)),
            vmem_limit_bytes=vmem_limit),
        cost_estimate=pl.CostEstimate(flops=flops, transcendentals=0,
                                      bytes_accessed=bytes_accessed),
    )(im_features, w1, b1, w2, b2, template)

    return out[:B]


def reference_forward(im_features, w1, b1, w2, b2, ctx, prefix, suffix):
    """Pure-JAX mirror of the PyTorch forward (f32), for correctness checking."""
    h = jnp.maximum(im_features @ w1 + b1, 0.0)
    bias = h @ w2 + b2                                        # (B, CTX_DIM)
    ctx_shifted = ctx[None, :, :] + bias[:, None, :]          # (B, N_CTX, CTX_DIM)
    prompts = []
    for b in range(im_features.shape[0]):
        ctx_i = jnp.broadcast_to(ctx_shifted[b][None], (N_CLS, N_CTX, CTX_DIM))
        pts_i = jnp.concatenate([prefix, ctx_i, suffix], axis=1)
        prompts.append(pts_i)
    return jnp.stack(prompts)


if __name__ == "__main__":
    key = jax.random.PRNGKey(0)
    keys = jax.random.split(key, 8)

    # deterministic synthetic parameters (shapes from PromptLearner.__init__)
    ctx = 0.02 * jax.random.normal(keys[0], (N_CTX, CTX_DIM), jnp.float32)    # nn.init.normal_(std=0.02)
    w1  = 0.05 * jax.random.normal(keys[1], (GNN_OUT, HID), jnp.float32)       # meta_net.linear1
    b1  = 0.01 * jax.random.normal(keys[2], (1, HID), jnp.float32)
    w2  = 0.05 * jax.random.normal(keys[3], (HID, CTX_DIM), jnp.float32)       # meta_net.linear2
    b2  = 0.01 * jax.random.normal(keys[4], (1, CTX_DIM), jnp.float32)
    # token_prefix / token_suffix buffers (frozen CLIP token embeddings, synthesized here)
    prefix = jax.random.normal(keys[5], (N_CLS, 1, CTX_DIM), jnp.float32)
    suffix = jax.random.normal(keys[6], (N_CLS, SUF_LEN, CTX_DIM), jnp.float32)

    im_features = jax.random.normal(keys[7], (BATCH, GNN_OUT), jnp.float32)

    out = prompt_learner_forward(im_features, w1, b1, w2, b2, ctx, prefix, suffix)
    out = jax.block_until_ready(out)

    ref = reference_forward(im_features, w1, b1, w2, b2, ctx, prefix, suffix)
    assert out.shape == (BATCH, N_CLS, CTX_LEN, CTX_DIM), out.shape
    # Prompts are emitted in bf16 (writeback-bound kernel); math stays in f32,
    # so only bf16 rounding (~0.4% rel) separates kernel output from the f32 reference.
    err = jnp.max(jnp.abs(out.astype(jnp.float32) - ref))
    assert jnp.allclose(out.astype(jnp.float32), ref, atol=3e-2, rtol=1e-2), float(err)

    print("KERNEL_OK")
</pallas_src>

<mosaic_0001>
module attributes {stable_mosaic.version = 11 : i64} {
  func.func @_prompt_kernel(%arg0: i32, %arg1: memref<2x128xf32, #tpu.memory_space<vmem>>, %arg2: memref<128x8xf32, #tpu.memory_space<vmem>>, %arg3: memref<1x8xf32, #tpu.memory_space<vmem>>, %arg4: memref<8x128xf32, #tpu.memory_space<vmem>>, %arg5: memref<1x128xf32, #tpu.memory_space<vmem>>, %arg6: memref<4x16x128xf32, #tpu.memory_space<vmem>>, %arg7: memref<2x4x16x128xbf16, #tpu.memory_space<vmem>>) attributes {dimension_semantics = [#tpu.dimension_semantics<arbitrary>], iteration_bounds = array<i64: 1>, scalar_prefetch = 0 : i64, scratch_operands = 0 : i64, tpu.core_type = #tpu.core_type<tc>, window_params = [{transform_indices = @transform_0, window_bounds = array<i64: 2, 128>}, {pipeline_mode = #tpu.pipeline_mode<synchronous>, transform_indices = @transform_1, window_bounds = array<i64: 128, 8>}, {pipeline_mode = #tpu.pipeline_mode<synchronous>, transform_indices = @transform_2, window_bounds = array<i64: 1, 8>}, {pipeline_mode = #tpu.pipeline_mode<synchronous>, transform_indices = @transform_3, window_bounds = array<i64: 8, 128>}, {pipeline_mode = #tpu.pipeline_mode<synchronous>, transform_indices = @transform_4, window_bounds = array<i64: 1, 128>}, {pipeline_mode = #tpu.pipeline_mode<synchronous>, transform_indices = @transform_5, window_bounds = array<i64: 4, 16, 128>}, {transform_indices = @transform_6, window_bounds = array<i64: 2, 4, 16, 128>}]} {
    %c0 = arith.constant 0 : index
    %c0_0 = arith.constant 0 : index
    %0 = vector.load %arg1[%c0, %c0_0] : memref<2x128xf32, #tpu.memory_space<vmem>>, vector<2x128xf32>
    %c0_1 = arith.constant 0 : index
    %c0_2 = arith.constant 0 : index
    %1 = vector.load %arg2[%c0_1, %c0_2] : memref<128x8xf32, #tpu.memory_space<vmem>>, vector<128x8xf32>
    %cst = arith.constant dense<0.000000e+00> : vector<2x8xf32>
    %2 = tpu.matmul %0, %1, %cst {dimension_numbers = #tpu.dot_dimension_numbers<[1], [0], [0], [1], [0, 0, 1, 1], [], []>} : vector<2x128xf32>, vector<128x8xf32>, vector<2x8xf32> -> vector<2x8xf32>
    %c0_3 = arith.constant 0 : index
    %c0_4 = arith.constant 0 : index
    %3 = vector.load %arg3[%c0_3, %c0_4] : memref<1x8xf32, #tpu.memory_space<vmem>>, vector<1x8xf32>
    %4 = vector.broadcast %3 : vector<1x8xf32> to vector<2x8xf32>
    %5 = arith.addf %2, %4 : vector<2x8xf32>
    %cst_5 = arith.constant 0.000000e+00 : f32
    %6 = vector.broadcast %cst_5 : f32 to vector<2x8xf32>
    %7 = arith.maximumf %5, %6 : vector<2x8xf32>
    %c0_6 = arith.constant 0 : index
    %c0_7 = arith.constant 0 : index
    %8 = vector.load %arg4[%c0_6, %c0_7] : memref<8x128xf32, #tpu.memory_space<vmem>>, vector<8x128xf32>
    %cst_8 = arith.constant dense<0.000000e+00> : vector<2x128xf32>
    %9 = tpu.matmul %7, %8, %cst_8 {dimension_numbers = #tpu.dot_dimension_numbers<[1], [0], [0], [1], [0, 0, 1, 1], [], []>} : vector<2x8xf32>, vector<8x128xf32>, vector<2x128xf32> -> vector<2x128xf32>
    %c0_9 = arith.constant 0 : index
    %c0_10 = arith.constant 0 : index
    %10 = vector.load %arg5[%c0_9, %c0_10] : memref<1x128xf32, #tpu.memory_space<vmem>>, vector<1x128xf32>
    %11 = vector.broadcast %10 : vector<1x128xf32> to vector<2x128xf32>
    %12 = arith.addf %9, %11 : vector<2x128xf32>
    %13 = tpu.iota {dimensions = array<i32: 0>} : vector<16x1xi32>
    %c1_i32 = arith.constant 1 : i32
    %14 = vector.broadcast %c1_i32 : i32 to vector<16x1xi32>
    %15 = arith.cmpi sge, %13, %14 : vector<16x1xi32>
    %c5_i32 = arith.constant 5 : i32
    %16 = vector.broadcast %c5_i32 : i32 to vector<16x1xi32>
    %17 = arith.cmpi slt, %13, %16 : vector<16x1xi32>
    %18 = arith.andi %15, %17 : vector<16x1xi1>
    %19 = arith.extui %18 : vector<16x1xi1> to vector<16x1xi32>
    %20 = arith.sitofp %19 : vector<16x1xi32> to vector<16x1xf32>
    %c0_11 = arith.constant 0 : index
    %c0_12 = arith.constant 0 : index
    %c0_13 = arith.constant 0 : index
    %21 = vector.load %arg6[%c0_11, %c0_12, %c0_13] : memref<4x16x128xf32, #tpu.memory_space<vmem>>, vector<4x16x128xf32>
    %22 = vector.shape_cast %21 : vector<4x16x128xf32> to vector<1x4x16x128xf32>
    %23 = vector.shape_cast %20 : vector<16x1xf32> to vector<1x1x16x1xf32>
    %24 = vector.shape_cast %12 : vector<2x128xf32> to vector<2x1x1x128xf32>
    %25 = vector.broadcast %23 : vector<1x1x16x1xf32> to vector<2x1x16x128xf32>
    %26 = vector.broadcast %24 : vector<2x1x1x128xf32> to vector<2x1x16x128xf32>
    %27 = arith.mulf %25, %26 : vector<2x1x16x128xf32>
    %28 = vector.broadcast %22 : vector<1x4x16x128xf32> to vector<2x4x16x128xf32>
    %29 = vector.broadcast %27 : vector<2x1x16x128xf32> to vector<2x4x16x128xf32>
    %30 = arith.addf %28, %29 : vector<2x4x16x128xf32>
    %31 = arith.truncf %30 : vector<2x4x16x128xf32> to vector<2x4x16x128xbf16>
    %c0_14 = arith.constant 0 : index
    %c0_15 = arith.constant 0 : index
    %c0_16 = arith.constant 0 : index
    %c0_17 = arith.constant 0 : index
    %32 = vector.load %arg7[%c0_14, %c0_15, %c0_16, %c0_17] : memref<2x4x16x128xbf16, #tpu.memory_space<vmem>>, vector<2x4x16x128xbf16>
    tpu.vector_store %arg7[%c0_14, %c0_15, %c0_16, %c0_17], %31 {strides = array<i32>} : memref<2x4x16x128xbf16, #tpu.memory_space<vmem>>, vector<2x4x16x128xbf16>,
    return
  }
  func.func @transform_0(%arg0: i32) -> (i32, i32) {
    %c0_i32 = arith.constant 0 : i32
    %c0_i32_0 = arith.constant 0 : i32
    return %arg0, %c0_i32 : i32, i32
  }
  func.func @transform_1(%arg0: i32) -> (i32, i32) {
    %c0_i32 = arith.constant 0 : i32
    %c0_i32_0 = arith.constant 0 : i32
    %c0_i32_1 = arith.constant 0 : i32
    return %c0_i32, %c0_i32_0 : i32, i32
  }
  func.func @transform_2(%arg0: i32) -> (i32, i32) {
    %c0_i32 = arith.constant 0 : i32
    %c0_i32_0 = arith.constant 0 : i32
    %c0_i32_1 = arith.constant 0 : i32
    return %c0_i32, %c0_i32_0 : i32, i32
  }
  func.func @transform_3(%arg0: i32) -> (i32, i32) {
    %c0_i32 = arith.constant 0 : i32
    %c0_i32_0 = arith.constant 0 : i32
    %c0_i32_1 = arith.constant 0 : i32
    return %c0_i32, %c0_i32_0 : i32, i32
  }
  func.func @transform_4(%arg0: i32) -> (i32, i32) {
    %c0_i32 = arith.constant 0 : i32
    %c0_i32_0 = arith.constant 0 : i32
    %c0_i32_1 = arith.constant 0 : i32
    return %c0_i32, %c0_i32_0 : i32, i32
  }
  func.func @transform_5(%arg0: i32) -> (i32, i32, i32) {
    %c0_i32 = arith.constant 0 : i32
    %c0_i32_0 = arith.constant 0 : i32
    %c0_i32_1 = arith.constant 0 : i32
    %c0_i32_2 = arith.constant 0 : i32
    return %c0_i32, %c0_i32_0, %c0_i32_1 : i32, i32, i32
  }
  func.func @transform_6(%arg0: i32) -> (i32, i32, i32, i32) {
    %c0_i32 = arith.constant 0 : i32
    %c0_i32_0 = arith.constant 0 : i32
    %c0_i32_1 = arith.constant 0 : i32
    %c0_i32_2 = arith.constant 0 : i32
    return %arg0, %c0_i32, %c0_i32_0, %c0_i32_1 : i32, i32, i32, i32
  }
}

</mosaic_0001>

<bundles_post_ra>
// kernel: tpu_custom_call.1
= control target key start
LH: loop header
LB: loop body
LE: loop exit
PB: predicated region body
PF: predicated region fallthrough
CT: control target
= control target key end

     0   :  { %v541_v1 = vmov 0.0   ;;  %vm542_vm0 = vmmov 0   ;;  %s689_s0 = inlined_call_operand.vmem [shape: f32[2,128], index: 0, kind: input, shape index: {}]   ;;  %s690_s1 = inlined_call_operand.vmem [shape: f32[128,8], index: 1, kind: input, shape index: {}]   ;;  %s691_s2 = inlined_call_operand.vmem [shape: f32[1,8], index: 2, kind: input, shape index: {}]   ;;  %s692_s3 = inlined_call_operand.vmem [shape: f32[8,128], index: 3, kind: input, shape index: {}]   ;;  %s693_s4 = inlined_call_operand.vmem [shape: f32[1,128], index: 4, kind: input, shape index: {}]   ;;  %s694_s5 = inlined_call_operand.vmem [shape: f32[4,16,128], index: 5, kind: input, shape index: {}]   ;;  %s695_s6 = inlined_call_operand.hbm [shape: bf16[2,4,16,128], index: 6, kind: output, shape index: {}]  }
   0x1   :  { %v40_v0 = vld [vmem:[%s690_s1 + $0x78] sm:$0xff]  ;;  %473 = vmatprep.subr.mxu0 %v541_v1  ;;  %v39_v2 = vld [vmem:[%s690_s1 + $0x70] sm:$0xff]  ;;  %505 = vmatprep.mubr.msk.f32.mxu0 %vm542_vm0, %v541_v1  ;;  %v38_v3 = vld [vmem:[%s690_s1 + $0x68] sm:$0xff] }
   0x2   :  { %474 = vmatpush3.msra.mxu0 %v40_v0  ;;  %508 = vmatprep.subr.mxu1 %v541_v1  ;;  %v37_v4 = vld [vmem:[%s690_s1 + $0x60] sm:$0xff] }
   0x3   :  { %475 = vmatprep.subr.mxu0 %v541_v1  ;;  %510 = vmatprep.mubr.msk.f32.mxu1 %vm542_vm0, %v541_v1 }
   0x4   :  { %476 = vmatpush3.msra.mxu0 %v39_v2 }
   0x5   :  { %477 = vmatprep.subr.mxu0 %v541_v1 }
   0x6   :  { %478 = vmatpush3.msra.mxu0 %v38_v3 }
   0x7   :  { %11 = vsyncpa [#allocation3], 0  ;;  %479 = vmatprep.subr.mxu0 %v541_v1  ;;  %v36_v5 = vld [vmem:[%s690_s1 + $0x58] sm:$0xff]  ;;  %v35_v6 = vld [vmem:[%s690_s1 + $0x50] sm:$0xff]  ;;  %vm127_vm1 = vcmask 64512   ;;  %v201_v24 = vlaneseq  ;;  %s544_s24 = smov [#allocation2]  }
   0x8   :  { %480 = vmatpush3.msra.mxu0 %v37_v4  ;;  %v34_v7 = vld [vmem:[%s690_s1 + $0x48] sm:$0xff]  ;;  %v33_v8 = vld [vmem:[%s690_s1 + $0x40] sm:$0xff]  ;;  %v32_v9 = vld [vmem:[%s690_s1 + $0x38] sm:$0xff]  ;;  %v543_v25 = vmov 1966171168   ;;  %s360_s25 = sshll.u32 %s544_s24, 4  ;;  %s361_s25 = int_to_ptr.vmem [resolvable:$true] %s360_s25 }
   0x9   :  { %481 = vmatprep.subr.mxu0 %v541_v1  ;;  %v31_v10 = vld [vmem:[%s690_s1 + $0x30] sm:$0xff]  ;;  %v30_v11 = vld [vmem:[%s690_s1 + $0x28] sm:$0xff]  ;;  %v29_v12 = vld [vmem:[%s690_s1 + $0x20] sm:$0xff]  ;;  %v224_v26 = vunpack.c.l.s4 %v543_v25  ;;  %v202_v27 = vshrl.u32 %v201_v24, 7  ;;  %p524_p1 = scmp.lt.s32.totalorder %s361_s25, %s361_s25 }
   0xa   :  { %482 = vmatpush3.msra.mxu0 %v36_v5  ;;  %v28_v13 = vld [vmem:[%s690_s1 + $0x18] sm:$0xff]  ;;  %v27_v14 = vld [vmem:[%s690_s1 + $0x10] sm:$0xff]  ;;  %v26_v15 = vld [vmem:[%s690_s1 + $0x8] sm:$0xff] }
   0xb   :  { %483 = vmatprep.subr.mxu0 %v541_v1  ;;  %v25_v16 = vld [vmem:[%s690_s1] sm:$0xff]  ;;  %v225_v28 = vunpack.c.0.s8 %v224_v26  ;;  %vm204_vm2 = vcmp.ge.s32.totalorder %v202_v27, 1  ;;  %vm206_vm3 = vcmp.lt.s32.totalorder %v202_v27, 5  ;;  %v247_v35 = vsub.s32 0, %v202_v27  ;;  %v215_v42 = vld [vmem:[%s694_s5 + $0x8] sm:$0xff]  ;;  %v216_v43 = vld [vmem:[%s694_s5 + $0x10] sm:$0xff] }
   0xc   :  { %484 = vmatpush3.msra.mxu0 %v35_v6  ;;  %v24_v17 = vld [vmem:[%s689_s0] sm:$0x3]  ;;  %vm208_vm4 = vmand %vm204_vm2, %vm206_vm3  ;;  %v217_v44 = vld [vmem:[%s694_s5 + $0x18] sm:$0xff] }
   0xd   :  { %485 = vmatprep.subr.mxu0 %v541_v1  ;;  %v119_v18 = vld [vmem:[%s692_s3] sm:$0xff]  ;;  %v228_v30 = vsub.s32 %v225_v28, %v202_v27  ;;  %v374_v38 = vsel %vm208_vm4, 1.0, %v541_v1  ;;  %v219_v46 = vld [vmem:[%s694_s5 + $0x28] sm:$0xff]  ;;  %v220_v50 = vld [vmem:[%s694_s5 + $0x30] sm:$0xff] }
   0xe   :  { %486 = vmatpush3.msra.mxu0 %v34_v7  ;;  %509 = vmatpush3.msra.mxu1 %v119_v18  ;;  %v371_v19 = vld [vmem:[%s691_s2] ss:$0 sm:$0xff]  ;;  %v221_v51 = vld [vmem:[%s694_s5 + $0x38] sm:$0xff] }
   0xf   :  { %487 = vmatprep.subr.mxu0 %v541_v1  ;;  %v372_v29 = vld [vmem:[%s693_s4] ss:$0 sm:$0xff] }
  0x10   :  { %488 = vmatpush3.msra.mxu0 %v33_v8  ;;  %v214_v41 = vld [vmem:[%s694_s5] sm:$0xff] }
  0x11   :  { %489 = vmatprep.subr.mxu0 %v541_v1  ;;  %v218_v45 = vld [vmem:[%s694_s5 + $0x20] sm:$0xff]  ;;  %s519_s5 = scalar_lea.vmem %s361_s25, 1024 }
  0x12   :  { %490 = vmatpush3.msra.mxu0 %v32_v9  ;;  %p520_p0 = scmp.ne.s32.totalorder %s361_s25, %s519_s5  ;;  %p525_p2 = scmp.lt.s32.totalorder %s519_s5, %s519_s5 }
  0x13   :  { %491 = vmatprep.subr.mxu0 %v541_v1 }
  0x14   :  { %492 = vmatpush3.msra.mxu0 %v31_v10  ;;  %p526_p3 = por %p525_p2, %p524_p1 }
  0x15   :  { %493 = vmatprep.subr.mxu0 %v541_v1 }
  0x16   :  { %494 = vmatpush3.msra.mxu0 %v30_v11  ;;  %p527_p4 = pnand %p526_p3, %p520_p0 }
  0x17   :  { %495 = vmatprep.subr.mxu0 %v541_v1 }
  0x18   :  { %496 = vmatpush3.msra.mxu0 %v29_v12 }
  0x19   :  { %497 = vmatprep.subr.mxu0 %v541_v1 }
  0x1a   :  { %498 = vmatpush3.msra.mxu0 %v28_v13 }
  0x1b   :  { %499 = vmatprep.subr.mxu0 %v541_v1 }
  0x1c   :  { %500 = vmatpush3.msra.mxu0 %v27_v14 }
  0x1d   :  { %501 = vmatprep.subr.mxu0 %v541_v1 }
  0x1e   :  { %502 = vmatpush3.msra.mxu0 %v26_v15 }
  0x1f   :  { %503 = vmatprep.subr.mxu0 %v541_v1 }
  0x20   :  { %504 = vmatpush3.msra.mxu0 %v25_v16 }
  0x21   :  { %506 = vmatmul.mubr.f32.vlgmr.msra.gmra.mxu0 %v24_v17 }
  0xe1   :  { %v114_v20 = vpop.f32.mrf.mxu0 }
  0xe2   :  { %v115_v21 = vadd.f32 %v371_v19, %v114_v20 }
  0xe3   :  { %v507_v22 = vpop.f32.mrf.mxu0 }
  0xe4   :  { %v118_v23 = vmax.f32 %v115_v21, 0.0 }
  0xe6   :  { %511 = vmatmul.mubr.msk.f32.vlgmr.msra.gmra.mxu1 %vm127_vm1, %v118_v23 }
 0x1a6   :  { %v197_v31 = vpop.f32.mrf.mxu1 }
 0x1a7   :  { %v198_v32 = vadd.f32 %v372_v29, %v197_v31 }
 0x1a8   :  { %v512_v33 = vpop.f32.mrf.mxu1 }
 0x1a9   :  { %v229_v34 = vrot.slane %v198_v32, %v228_v30 }
 0x1ab   :  { %v230_v36 = vcombine.high %v229_v34, %v229_v34  ;;  %v237_v37 = vrot.slane %v229_v34, %v228_v30 }
 0x1ad   :  { %v244_v39 = vrot.slane %v230_v36, %v228_v30  ;;  %v248_v40 = vrot.slane %v237_v37, %v247_v35 }
 0x1af   :  { %v252_v47 = vrot.slane %v244_v39, %v247_v35  ;;  %v255_v48 = vmul.f32 %v374_v38, %v248_v40  ;;  %v256_v49 = vmul.f32 0.0, %v248_v40 }
 0x1b1   :  { %v257_v52 = vmul.f32 %v374_v38, %v252_v47  ;;  %v258_v53 = vmul.f32 0.0, %v252_v47  ;;  %v259_v54 = vadd.f32 %v255_v48, %v214_v41  ;;  %v260_v55 = vadd.f32 %v256_v49, %v215_v42 }
 0x1b2   :  { %v261_v56 = vadd.f32 %v255_v48, %v216_v43  ;;  %v262_v57 = vadd.f32 %v256_v49, %v217_v44  ;;  %v263_v58 = vadd.f32 %v255_v48, %v218_v45  ;;  %v264_v59 = vadd.f32 %v256_v49, %v219_v46 }
 0x1b3   :  { %v265_v60 = vadd.f32 %v255_v48, %v220_v50  ;;  %v266_v61 = vadd.f32 %v256_v49, %v221_v51  ;;  %v267_v62 = vadd.f32 %v257_v52, %v214_v41  ;;  %v268_v63 = vadd.f32 %v258_v53, %v215_v42 }
 0x1b4   :  { %v269_v0 = vadd.f32 %v257_v52, %v216_v43  ;;  %v270_v1 = vadd.f32 %v258_v53, %v217_v44  ;;  %v271_v2 = vadd.f32 %v257_v52, %v218_v45  ;;  %v272_v3 = vadd.f32 %v258_v53, %v219_v46 }
 0x1b5   :  { %v273_v4 = vadd.f32 %v257_v52, %v220_v50  ;;  %v274_v5 = vadd.f32 %v258_v53, %v221_v51  ;;  %v410_v6 = vpack.c.bf16 %v260_v55, %v259_v54  ;;  %v415_v7 = vpack.c.bf16 %v262_v57, %v261_v56 }
 0x1b6   :  { %v420_v8 = vpack.c.bf16 %v264_v59, %v263_v58  ;;  %v425_v9 = vpack.c.bf16 %v266_v61, %v265_v60  ;;  %v430_v10 = vpack.c.bf16 %v268_v63, %v267_v62  ;;  %v435_v11 = vpack.c.bf16 %v270_v1, %v269_v0 }
 0x1b7   :  { %411 = vst [vmem:[#allocation2] sm:$0xff] %v410_v6   ;;  %447 = vst [vmem:[#allocation2 + $0x8] sm:$0xff] %v415_v7   ;;  %v440_v12 = vpack.c.bf16 %v272_v3, %v271_v2  ;;  %v445_v13 = vpack.c.bf16 %v274_v5, %v273_v4 }
 0x1b8   :  { %448 = vst [vmem:[#allocation2 + $0x10] sm:$0xff] %v420_v8   ;;  %449 = vst [vmem:[#allocation2 + $0x18] sm:$0xff] %v425_v9  }
 0x1b9   :  { %450 = vst [vmem:[#allocation2 + $0x20] sm:$0xff] %v430_v10   ;;  %451 = vst [vmem:[#allocation2 + $0x28] sm:$0xff] %v435_v11  }
 0x1ba   :  { %452 = vst [vmem:[#allocation2 + $0x30] sm:$0xff] %v440_v12   ;;  %453 = vst [vmem:[#allocation2 + $0x38] sm:$0xff] %v445_v13  }
 0x1bb   :  { %530 = shalt.err (!%p527_p4)
}
 0x1bc   :  { %s545_s26 = smov 64   ;;  %s546_s27 = smov 4  }
 0x1bd   :  { %366 = dma.vmem_to_hbm [thread:$0]  %s361_s25, 1024, %s695_s6, [#allocation3], %s545_s26, %s545_s26, %s546_s27  }
 0x1be   :  { %539 = dma.done.wait [#allocation3], 1024  }
 0x1bf   :  { %540 = vsyncadd [#allocation3], 4294966272 }
 0x1c0   :  { %370 = vsyncpa [#allocation3], 1 }

</bundles_post_ra>
